<compile_context>
chip_gen: v7x
topology: tpu7x:2x2x1
jax: 0.10.0
libtpu: 0.0.40
codegen_flags: <defaults>
</compile_context>

<pallas_src>
import functools

import jax
import jax.numpy as jnp
from jax import lax
from jax.experimental import pallas as pl
from jax.experimental.pallas import tpu as pltpu

_NEG_BIG = -3.0e38            # running-max init; avoids -inf so (m - m_new) stays finite
_DEFAULT_CLASS_CHUNK = 2048   # lanes per class chunk (multiple of 128)


def _ls_ce_kernel(x_ref, t_ref, out_ref, m_sc, se_sc, sx_sc, xt_sc, *,
                  smoothing: float, num_classes: int, chunk: int):
    """Label-smoothing CE with online (chunked) logsumexp.

    grid = (row_tiles [parallel], class_chunks [arbitrary])
      x_ref   : (br, chunk) logits tile, storage dtype
      t_ref   : (br, 1)     int32 targets (block index constant across chunks)
      out_ref : (br, 1)     f32 per-row loss (revisited; written on last chunk)
      *_sc    : (br, 1)     f32 running max / sum(exp) / sum(x) / x[target]
    """
    j = pl.program_id(1)
    last = pl.num_programs(1) - 1

    @pl.when(j == 0)
    def _init():
        m_sc[...] = jnp.full_like(m_sc, _NEG_BIG)
        se_sc[...] = jnp.zeros_like(se_sc)
        sx_sc[...] = jnp.zeros_like(sx_sc)
        xt_sc[...] = jnp.zeros_like(xt_sc)

    t = t_ref[...].astype(jnp.int32)                                 # (br, 1)
    xc = x_ref[...]                                                  # (br, chunk)
    col = j * chunk + lax.broadcasted_iota(jnp.int32, xc.shape, 1)   # global col

    def update(masked: bool):
        m = m_sc[...]
        if masked:
            # Ragged last chunk: lanes with col >= num_classes hold garbage
            # (Pallas edge block) and must never reach the reductions.
            valid = col < num_classes
            xc32 = jnp.where(valid, xc.astype(jnp.float32), 0.0)
            cm = jnp.max(jnp.where(valid, xc32, _NEG_BIG),
                         axis=-1, keepdims=True)
            m_new = jnp.maximum(m, cm)
            e = jnp.where(valid, jnp.exp(xc32 - m_new), 0.0)
        else:
            # Full chunk: max is exact in the storage dtype (bf16 stays packed
            # on v6e/v7x); cast to f32 only for exp and the accumulating sums.
            cm = jnp.max(xc, axis=-1, keepdims=True).astype(jnp.float32)
            xc32 = xc.astype(jnp.float32)
            m_new = jnp.maximum(m, cm)
            e = jnp.exp(xc32 - m_new)
        # Target-logit gather: exactly one match per row across all chunks
        # (targets < num_classes), so a masked sum is exact.
        picked = jnp.sum(jnp.where(col == t, xc32, 0.0),
                         axis=-1, keepdims=True)
        corr = jnp.exp(m - m_new)                         # online-LSE rescale
        se_sc[...] = se_sc[...] * corr + jnp.sum(e, axis=-1, keepdims=True)
        sx_sc[...] = sx_sc[...] + jnp.sum(xc32, axis=-1, keepdims=True)
        xt_sc[...] = xt_sc[...] + picked
        m_sc[...] = m_new

    if num_classes % chunk == 0:
        update(masked=False)                  # every chunk is full
    else:
        @pl.when(j != last)
        def _full_chunk():
            update(masked=False)

        @pl.when(j == last)
        def _ragged_chunk():
            update(masked=True)

    @pl.when(j == last)
    def _finalize():
        confidence = 1.0 - smoothing
        lse = m_sc[...] + jnp.log(se_sc[...])             # logsumexp(x) per row
        # loss = confidence*(lse - x[t]) + smoothing*(lse - mean(x))
        loss = (lse - confidence * xt_sc[...]
                - (smoothing / num_classes) * sx_sc[...])
        out_ref[...] = loss.astype(out_ref.dtype)


def _vmem_limit_bytes() -> int:
    cap = 128 * 1024 * 1024
    try:
        cap = int(getattr(pltpu.get_tpu_info(), "vmem_capacity_bytes", cap))
    except Exception:
        pass
    # ~48 MiB on 128 MiB parts (v5e/v6e), ~35 MiB on v7x's 64 MiB per-TC VMEM.
    return min(48 * 1024 * 1024, (cap * 55) // 100)


def _choose_block_rows(n: int, chunk: int, itemsize: int,
                       vmem_limit: int) -> int:
    # Per row of a grid step: double-buffered input chunk (storage dtype) plus
    # ~4 chunk-wide f32/i32 in-kernel temporaries (f32 cast, exp, iota,
    # select) — the part the previous sizer under-counted.
    per_row = chunk * (2 * itemsize + 16)
    budget = vmem_limit // 3
    br = budget // per_row
    br = max(8, min(1024, (br // 8) * 8))
    if n >= 32:
        # Keep >= 4 row tiles when N allows: 2+ pipelined steps per v7x
        # TensorCore under dimension_semantics=("parallel", ...).
        br = min(br, max(8, (n // 4 // 8) * 8))
    return min(br, ((n + 7) // 8) * 8)


def label_smoothing_cross_entropy(x, target, *, smoothing: float = 0.1,
                                  block_rows: int | None = None,
                                  class_chunk: int | None = None):
    """x: (N, C) float logits; target: (N,) int labels -> (N,) float32 loss."""
    assert smoothing < 1.0
    assert x.ndim == 2 and target.ndim == 1 and target.shape[0] == x.shape[0]
    n, c = x.shape
    itemsize = jnp.dtype(x.dtype).itemsize
    vmem_limit = _vmem_limit_bytes()

    cc = _DEFAULT_CLASS_CHUNK if class_chunk is None else int(class_chunk)
    if cc >= c:
        cc = c                                 # one chunk covers all classes
    else:
        assert cc % 128 == 0, "class_chunk must be a multiple of 128"

    if block_rows is None:
        br = _choose_block_rows(n, cc, itemsize, vmem_limit)
    else:
        br = max(8, (int(block_rows) // 8) * 8)

    grid = (pl.cdiv(n, br), pl.cdiv(c, cc))
    t2d = target.astype(jnp.int32).reshape(n, 1)

    kernel = functools.partial(_ls_ce_kernel, smoothing=float(smoothing),
                               num_classes=c, chunk=cc)

    out = pl.pallas_call(
        kernel,
        out_shape=jax.ShapeDtypeStruct((n, 1), jnp.float32),
        grid_spec=pltpu.PrefetchScalarGridSpec(
            num_scalar_prefetch=0,
            grid=grid,
            in_specs=[
                pl.BlockSpec((br, cc), lambda i, j: (i, j)),   # logits chunk
                pl.BlockSpec((br, 1), lambda i, j: (i, 0)),    # targets (const over j)
            ],
            out_specs=pl.BlockSpec((br, 1), lambda i, j: (i, 0)),
            scratch_shapes=[pltpu.VMEM((br, 1), jnp.float32)] * 4,
        ),
        compiler_params=pltpu.CompilerParams(
            dimension_semantics=("parallel", "arbitrary"),
            vmem_limit_bytes=vmem_limit,
        ),
    )(x, t2d)

    return out.reshape(-1)


def _reference(x, target, smoothing):
    logprobs = jax.nn.log_softmax(x.astype(jnp.float32), axis=-1)
    nll = -jnp.take_along_axis(logprobs, target[:, None].astype(jnp.int32),
                               axis=-1)[:, 0]
    smooth = -jnp.mean(logprobs, axis=-1)
    return (1.0 - smoothing) * nll + smoothing * smooth


if __name__ == "__main__":
    key = jax.random.PRNGKey(0)
    k1, k2, k3, k4, k5, k6, k7, k8 = jax.random.split(key, 8)

    # Case 1: small, tile-aligned f32 (the module's typical use).
    n1, c1 = 8, 32
    x1 = jax.random.normal(k1, (n1, c1), dtype=jnp.float32)
    t1 = jax.random.randint(k2, (n1,), 0, c1, dtype=jnp.int32)
    got1 = jax.block_until_ready(
        label_smoothing_cross_entropy(x1, t1, smoothing=0.1))
    ref1 = _reference(x1, t1, 0.1)
    assert got1.shape == (n1,)
    assert jnp.allclose(got1, ref1, atol=1e-5), (got1, ref1)

    # Case 2: ragged N, non-128 C, multiple row tiles (edge row blocks).
    n2, c2 = 50, 40
    x2 = jax.random.normal(k3, (n2, c2), dtype=jnp.float32)
    t2 = jax.random.randint(k4, (n2,), 0, c2, dtype=jnp.int32)
    got2 = jax.block_until_ready(
        label_smoothing_cross_entropy(x2, t2, smoothing=0.1, block_rows=16))
    ref2 = _reference(x2, t2, 0.1)
    assert jnp.allclose(got2, ref2, atol=1e-5), (got2, ref2)

    # Case 3: bf16, C > chunk -> online logsumexp over 3 class chunks with a
    # masked ragged last chunk (4200 = 2*2048 + 104).
    n3, c3 = 24, 4200
    x3 = (2.0 * jax.random.normal(k5, (n3, c3), dtype=jnp.float32)
          ).astype(jnp.bfloat16)
    t3 = jax.random.randint(k6, (n3,), 0, c3, dtype=jnp.int32)
    got3 = jax.block_until_ready(
        label_smoothing_cross_entropy(x3, t3, smoothing=0.1))
    ref3 = _reference(x3, t3, 0.1)
    assert jnp.allclose(got3, ref3, atol=1e-3, rtol=1e-3), (got3, ref3)

    # Case 4: bf16 with unaligned C in a single chunk (packed-dtype masked
    # lane-reduce path).
    n4, c4 = 16, 72
    x4 = jax.random.normal(k7, (n4, c4), dtype=jnp.float32).astype(jnp.bfloat16)
    t4 = jax.random.randint(k8, (n4,), 0, c4, dtype=jnp.int32)
    got4 = jax.block_until_ready(
        label_smoothing_cross_entropy(x4, t4, smoothing=0.1))
    ref4 = _reference(x4, t4, 0.1)
    assert jnp.allclose(got4, ref4, atol=1e-3, rtol=1e-3), (got4, ref4)

    print("KERNEL_OK")
</pallas_src>

<mosaic_0001>
module attributes {stable_mosaic.version = 11 : i64} {
  func.func @_ls_ce_kernel(%arg0: i32, %arg1: i32, %arg2: memref<8x32xf32, #tpu.memory_space<vmem>>, %arg3: memref<8x1xi32, #tpu.memory_space<vmem>>, %arg4: memref<8x1xf32, #tpu.memory_space<vmem>>, %arg5: memref<8x1xf32, #tpu.memory_space<vmem>>, %arg6: memref<8x1xf32, #tpu.memory_space<vmem>>, %arg7: memref<8x1xf32, #tpu.memory_space<vmem>>, %arg8: memref<8x1xf32, #tpu.memory_space<vmem>>) attributes {dimension_semantics = [#tpu.dimension_semantics<parallel>, #tpu.dimension_semantics<arbitrary>], iteration_bounds = array<i64: 1, 1>, scalar_prefetch = 0 : i64, scratch_operands = 4 : i64, tpu.core_type = #tpu.core_type<tc>, window_params = [{transform_indices = @transform_0, window_bounds = array<i64: 8, 32>}, {transform_indices = @transform_1, window_bounds = array<i64: 8, 1>}, {transform_indices = @transform_2, window_bounds = array<i64: 8, 1>}]} {
    %c0_i32 = arith.constant 0 : i32
    %0 = arith.cmpi eq, %arg1, %c0_i32 : i32
    %1 = arith.extui %0 : i1 to i32
    %c0_i32_0 = arith.constant 0 : i32
    %2 = arith.cmpi ne, %1, %c0_i32_0 : i32
    scf.if %2 {
      %cst_26 = arith.constant -3.000000e+38 : f32
      %42 = vector.broadcast %cst_26 : f32 to vector<8x1xf32>
      %c0_27 = arith.constant 0 : index
      %c0_28 = arith.constant 0 : index
      %43 = vector.load %arg5[%c0_27, %c0_28] : memref<8x1xf32, #tpu.memory_space<vmem>>, vector<8x1xf32>
      tpu.vector_store %arg5[%c0_27, %c0_28], %42 {strides = array<i32>} : memref<8x1xf32, #tpu.memory_space<vmem>>, vector<8x1xf32>,
      %cst_29 = arith.constant 0.000000e+00 : f32
      %44 = vector.broadcast %cst_29 : f32 to vector<8x1xf32>
      %c0_30 = arith.constant 0 : index
      %c0_31 = arith.constant 0 : index
      %45 = vector.load %arg6[%c0_30, %c0_31] : memref<8x1xf32, #tpu.memory_space<vmem>>, vector<8x1xf32>
      tpu.vector_store %arg6[%c0_30, %c0_31], %44 {strides = array<i32>} : memref<8x1xf32, #tpu.memory_space<vmem>>, vector<8x1xf32>,
      %cst_32 = arith.constant 0.000000e+00 : f32
      %46 = vector.broadcast %cst_32 : f32 to vector<8x1xf32>
      %c0_33 = arith.constant 0 : index
      %c0_34 = arith.constant 0 : index
      %47 = vector.load %arg7[%c0_33, %c0_34] : memref<8x1xf32, #tpu.memory_space<vmem>>, vector<8x1xf32>
      tpu.vector_store %arg7[%c0_33, %c0_34], %46 {strides = array<i32>} : memref<8x1xf32, #tpu.memory_space<vmem>>, vector<8x1xf32>,
      %cst_35 = arith.constant 0.000000e+00 : f32
      %48 = vector.broadcast %cst_35 : f32 to vector<8x1xf32>
      %c0_36 = arith.constant 0 : index
      %c0_37 = arith.constant 0 : index
      %49 = vector.load %arg8[%c0_36, %c0_37] : memref<8x1xf32, #tpu.memory_space<vmem>>, vector<8x1xf32>
      tpu.vector_store %arg8[%c0_36, %c0_37], %48 {strides = array<i32>} : memref<8x1xf32, #tpu.memory_space<vmem>>, vector<8x1xf32>,
    } else {
    }
    %c0 = arith.constant 0 : index
    %c0_1 = arith.constant 0 : index
    %3 = vector.load %arg3[%c0, %c0_1] : memref<8x1xi32, #tpu.memory_space<vmem>>, vector<8x1xi32>
    %c0_2 = arith.constant 0 : index
    %c0_3 = arith.constant 0 : index
    %4 = vector.load %arg2[%c0_2, %c0_3] : memref<8x32xf32, #tpu.memory_space<vmem>>, vector<8x32xf32>
    %c32_i32 = arith.constant 32 : i32
    %5 = arith.muli %arg1, %c32_i32 : i32
    %6 = tpu.iota {dimensions = array<i32: 1>} : vector<8x32xi32>
    %7 = vector.broadcast %5 : i32 to vector<8x32xi32>
    %8 = arith.addi %7, %6 : vector<8x32xi32>
    %c0_4 = arith.constant 0 : index
    %c0_5 = arith.constant 0 : index
    %9 = vector.load %arg5[%c0_4, %c0_5] : memref<8x1xf32, #tpu.memory_space<vmem>>, vector<8x1xf32>
    %cst = arith.constant dense<0xFF800000> : vector<8xf32>
    %10 = vector.multi_reduction <maximumf>, %4, %cst [1] : vector<8x32xf32> to vector<8xf32>
    %11 = vector.shape_cast %10 : vector<8xf32> to vector<8x1xf32>
    %12 = arith.maximumf %9, %11 : vector<8x1xf32>
    %13 = vector.broadcast %12 : vector<8x1xf32> to vector<8x32xf32>
    %14 = arith.subf %4, %13 : vector<8x32xf32>
    %15 = math.exp %14 : vector<8x32xf32>
    %16 = vector.broadcast %3 : vector<8x1xi32> to vector<8x32xi32>
    %17 = arith.cmpi eq, %8, %16 : vector<8x32xi32>
    %cst_6 = arith.constant 0.000000e+00 : f32
    %18 = vector.broadcast %cst_6 : f32 to vector<8x32xf32>
    %19 = arith.select %17, %4, %18 : vector<8x32xi1>, vector<8x32xf32>
    %cst_7 = arith.constant dense<0.000000e+00> : vector<8xf32>
    %20 = vector.multi_reduction <add>, %19, %cst_7 [1] : vector<8x32xf32> to vector<8xf32>
    %21 = vector.shape_cast %20 : vector<8xf32> to vector<8x1xf32>
    %22 = arith.subf %9, %12 : vector<8x1xf32>
    %23 = math.exp %22 : vector<8x1xf32>
    %c0_8 = arith.constant 0 : index
    %c0_9 = arith.constant 0 : index
    %24 = vector.load %arg6[%c0_8, %c0_9] : memref<8x1xf32, #tpu.memory_space<vmem>>, vector<8x1xf32>
    %25 = arith.mulf %24, %23 : vector<8x1xf32>
    %cst_10 = arith.constant dense<0.000000e+00> : vector<8xf32>
    %26 = vector.multi_reduction <add>, %15, %cst_10 [1] : vector<8x32xf32> to vector<8xf32>
    %27 = vector.shape_cast %26 : vector<8xf32> to vector<8x1xf32>
    %28 = arith.addf %25, %27 : vector<8x1xf32>
    %c0_11 = arith.constant 0 : index
    %c0_12 = arith.constant 0 : index
    %29 = vector.load %arg6[%c0_11, %c0_12] : memref<8x1xf32, #tpu.memory_space<vmem>>, vector<8x1xf32>
    tpu.vector_store %arg6[%c0_11, %c0_12], %28 {strides = array<i32>} : memref<8x1xf32, #tpu.memory_space<vmem>>, vector<8x1xf32>,
    %c0_13 = arith.constant 0 : index
    %c0_14 = arith.constant 0 : index
    %30 = vector.load %arg7[%c0_13, %c0_14] : memref<8x1xf32, #tpu.memory_space<vmem>>, vector<8x1xf32>
    %cst_15 = arith.constant dense<0.000000e+00> : vector<8xf32>
    %31 = vector.multi_reduction <add>, %4, %cst_15 [1] : vector<8x32xf32> to vector<8xf32>
    %32 = vector.shape_cast %31 : vector<8xf32> to vector<8x1xf32>
    %33 = arith.addf %30, %32 : vector<8x1xf32>
    %c0_16 = arith.constant 0 : index
    %c0_17 = arith.constant 0 : index
    %34 = vector.load %arg7[%c0_16, %c0_17] : memref<8x1xf32, #tpu.memory_space<vmem>>, vector<8x1xf32>
    tpu.vector_store %arg7[%c0_16, %c0_17], %33 {strides = array<i32>} : memref<8x1xf32, #tpu.memory_space<vmem>>, vector<8x1xf32>,
    %c0_18 = arith.constant 0 : index
    %c0_19 = arith.constant 0 : index
    %35 = vector.load %arg8[%c0_18, %c0_19] : memref<8x1xf32, #tpu.memory_space<vmem>>, vector<8x1xf32>
    %36 = arith.addf %35, %21 : vector<8x1xf32>
    %c0_20 = arith.constant 0 : index
    %c0_21 = arith.constant 0 : index
    %37 = vector.load %arg8[%c0_20, %c0_21] : memref<8x1xf32, #tpu.memory_space<vmem>>, vector<8x1xf32>
    tpu.vector_store %arg8[%c0_20, %c0_21], %36 {strides = array<i32>} : memref<8x1xf32, #tpu.memory_space<vmem>>, vector<8x1xf32>,
    %c0_22 = arith.constant 0 : index
    %c0_23 = arith.constant 0 : index
    %38 = vector.load %arg5[%c0_22, %c0_23] : memref<8x1xf32, #tpu.memory_space<vmem>>, vector<8x1xf32>
    tpu.vector_store %arg5[%c0_22, %c0_23], %12 {strides = array<i32>} : memref<8x1xf32, #tpu.memory_space<vmem>>, vector<8x1xf32>,
    %c0_i32_24 = arith.constant 0 : i32
    %39 = arith.cmpi eq, %arg1, %c0_i32_24 : i32
    %40 = arith.extui %39 : i1 to i32
    %c0_i32_25 = arith.constant 0 : i32
    %41 = arith.cmpi ne, %40, %c0_i32_25 : i32
    scf.if %41 {
      %c0_26 = arith.constant 0 : index
      %c0_27 = arith.constant 0 : index
      %42 = vector.load %arg5[%c0_26, %c0_27] : memref<8x1xf32, #tpu.memory_space<vmem>>, vector<8x1xf32>
      %c0_28 = arith.constant 0 : index
      %c0_29 = arith.constant 0 : index
      %43 = vector.load %arg6[%c0_28, %c0_29] : memref<8x1xf32, #tpu.memory_space<vmem>>, vector<8x1xf32>
      %44 = math.log %43 : vector<8x1xf32>
      %45 = arith.addf %42, %44 : vector<8x1xf32>
      %c0_30 = arith.constant 0 : index
      %c0_31 = arith.constant 0 : index
      %46 = vector.load %arg8[%c0_30, %c0_31] : memref<8x1xf32, #tpu.memory_space<vmem>>, vector<8x1xf32>
      %cst_32 = arith.constant 0.899999976 : f32
      %47 = vector.broadcast %cst_32 : f32 to vector<8x1xf32>
      %48 = arith.mulf %47, %46 : vector<8x1xf32>
      %49 = arith.subf %45, %48 : vector<8x1xf32>
      %c0_33 = arith.constant 0 : index
      %c0_34 = arith.constant 0 : index
      %50 = vector.load %arg7[%c0_33, %c0_34] : memref<8x1xf32, #tpu.memory_space<vmem>>, vector<8x1xf32>
      %cst_35 = arith.constant 3.125000e-03 : f32
      %51 = vector.broadcast %cst_35 : f32 to vector<8x1xf32>
      %52 = arith.mulf %51, %50 : vector<8x1xf32>
      %53 = arith.subf %49, %52 : vector<8x1xf32>
      %c0_36 = arith.constant 0 : index
      %c0_37 = arith.constant 0 : index
      %54 = vector.load %arg4[%c0_36, %c0_37] : memref<8x1xf32, #tpu.memory_space<vmem>>, vector<8x1xf32>
      tpu.vector_store %arg4[%c0_36, %c0_37], %53 {strides = array<i32>} : memref<8x1xf32, #tpu.memory_space<vmem>>, vector<8x1xf32>,
    } else {
    }
    return
  }
  func.func @transform_0(%arg0: i32, %arg1: i32) -> (i32, i32) {
    %c0_i32 = arith.constant 0 : i32
    return %arg0, %arg1 : i32, i32
  }
  func.func @transform_1(%arg0: i32, %arg1: i32) -> (i32, i32) {
    %c0_i32 = arith.constant 0 : i32
    %c0_i32_0 = arith.constant 0 : i32
    return %arg0, %c0_i32 : i32, i32
  }
  func.func @transform_2(%arg0: i32, %arg1: i32) -> (i32, i32) {
    %c0_i32 = arith.constant 0 : i32
    %c0_i32_0 = arith.constant 0 : i32
    return %arg0, %c0_i32 : i32, i32
  }
}

</mosaic_0001>

<bundles_post_ra>
// kernel: tpu_custom_call.1
= control target key start
LH: loop header
LB: loop body
LE: loop exit
PB: predicated region body
PF: predicated region fallthrough
CT: control target
= control target key end

     0   :  { %vm28_vm0 = vcmask 261120   ;;  %vm15_vm1 = vcmask 7168   ;;  %v100_v1 = vmov -3e+38   ;;  %v101_v3 = vmov 0   ;;  %s140_s0 = inlined_call_operand.vmem [shape: f32[8,32], index: 0, kind: input, shape index: {}]   ;;  %s141_s1 = inlined_call_operand.vmem [shape: s32[8,1], index: 1, kind: input, shape index: {}]   ;;  %s142_s2 = inlined_call_operand.vmem [shape: f32[8,1], index: 2, kind: output, shape index: {}]  }
   0x1   :  { %v21_v0 = vld [vmem:[%s140_s0] sm:$0xff]  ;;  %16 = vst.msk [vmem:[#allocation2] sm:$0xff] %vm15_vm1, %v100_v1  ;;  %92 = vset.pattern.permute.xlu0 %v101_v3  ;;  %93 = vset.pattern.permute.xlu1 %v101_v3  ;;  %v102_v4 = vmov 0.0   ;;  %v23_v13 = vlaneseq }
   0x2   :  { %v29_v2 = vsel %vm28_vm0, %v21_v0, -inf  ;;  %17 = vst.msk [vmem:[#allocation3] sm:$0xff] %vm15_vm1, %v102_v4  ;;  %18 = vst.msk [vmem:[#allocation4] sm:$0xff] %vm15_vm1, %v102_v4  ;;  %v20_v5 = vld [vmem:[%s141_s1] sm:$0xff]  ;;  %v61_v20 = vsel %vm28_vm0, %v21_v0, 0.0 }
   0x3   :  { %30 = vmax.xlane.f32.xlu0 %v29_v2  ;;  %19 = vst.msk [vmem:[#allocation5] sm:$0xff] %vm15_vm1, %v102_v4  ;;  %42 = vperm.xlu1 %93, %v20_v5   ;;  %v24_v14 = vand.u32 127, %v23_v13 }
   0x8   :  { %v27_v6 = vld [vmem:[#allocation2] sm:$0xff] }
   0x9   :  { %v52_v23 = vld [vmem:[#allocation3] sm:$0xff]  ;;  %v60_v30 = vld [vmem:[#allocation4] sm:$0xff] }
   0xa   :  { %v66_v27 = vld [vmem:[#allocation5] sm:$0xff] }
  0x82   :  { %v43_v15 = vpop.permute.xlu1 %42 }
  0x83   :  { %vm44_vm2 = vcmp.eq.s32.totalorder %v24_v14, %v43_v15 }
  0x84   :  { %v45_v17 = vsel %vm44_vm2, %v21_v0, 0.0 }
  0x85   :  { %v46_v19 = vsel %vm28_vm0, %v45_v17, 0.0 }
  0x90   :  { %v31_v7 = vpop.xlane.xlu0 %30 }
  0x91   :  { %v32_v8 = vmax.f32 %v27_v6, %v31_v7 }
  0x93   :  { %v49_v9 = vsub.f32 %v27_v6, %v32_v8  ;;  %69 = vst.msk [vmem:[#allocation2] sm:$0xff] %vm15_vm1, %v32_v8  ;;  %35 = vperm.xlu0 %92, %v32_v8  }
  0x95   :  { %v50_v21 = vmul.f32 1.442695, %v49_v9 }
  0x9a   :  { %v73_v38 = vld [vmem:[#allocation2] sm:$0xff] }
 0x112   :  { %v36_v10 = vpop.permute.xlu0 %35 }
 0x113   :  { %v38_v11 = vsub.f32 %v21_v0, %v36_v10 }
 0x115   :  { %v39_v12 = vmul.f32 1.442695, %v38_v11 }
 0x117   :  { %94 = vpow2.f32 %v39_v12 }
 0x118   :  { %96 = vpow2.f32 %v50_v21 }
 0x121   :  { %v95_v16 = vpop.eup %94 }
 0x122   :  { %v54_v18 = vsel %vm28_vm0, %v95_v16, 0.0  ;;  %v97_v22 = vpop.eup %96 }
 0x123   :  { %55 = vadd.xlane.f32.xlu1 %v54_v18  ;;  %v53_v24 = vmul.f32 %v97_v22, %v52_v23 }
 0x127   :  { %47 = vadd.xlane.f32.xlu1 %v46_v19 }
 0x12b   :  { %62 = vadd.xlane.f32.xlu1 %v61_v20 }
 0x1b0   :  { %v56_v25 = vpop.xlane.xlu1 %55 }
 0x1b1   :  { %v57_v26 = vadd.f32 %v56_v25, %v53_v24 }
 0x1b3   :  { %59 = vst.msk [vmem:[#allocation3] sm:$0xff] %vm15_vm1, %v57_v26 }
 0x1b4   :  { %v48_v28 = vpop.xlane.xlu1 %47 }
 0x1b5   :  { %v67_v29 = vadd.f32 %v66_v27, %v48_v28 }
 0x1b7   :  { %68 = vst.msk [vmem:[#allocation5] sm:$0xff] %vm15_vm1, %v67_v29 }
 0x1b8   :  { %v63_v31 = vpop.xlane.xlu1 %62 }
 0x1b9   :  { %v64_v32 = vadd.f32 %v63_v31, %v60_v30 }
 0x1ba   :  { %v74_v33 = vld [vmem:[#allocation3] sm:$0xff] }
 0x1bb   :  { %98 = vlog2.f32 %v74_v33  ;;  %65 = vst.msk [vmem:[#allocation4] sm:$0xff] %vm15_vm1, %v64_v32 }
 0x1be   :  { %v78_v35 = vld [vmem:[#allocation5] sm:$0xff] }
 0x1bf   :  { %v79_v40 = vmul.f32 0.9, %v78_v35 }
 0x1c2   :  { %v81_v36 = vld [vmem:[#allocation4] sm:$0xff] }
 0x1c3   :  { %v82_v41 = vmul.f32 0.003125, %v81_v36 }
 0x1c5   :  { %v99_v34 = vpop.eup %98 }
 0x1c6   :  { %v76_v37 = vmul.f32 0.6931472, %v99_v34 }
 0x1c8   :  { %v77_v39 = vadd.f32 %v76_v37, %v73_v38 }
 0x1ca   :  { %v80_v42 = vsub.f32 %v77_v39, %v79_v40 }
 0x1cc   :  { %v83_v43 = vsub.f32 %v80_v42, %v82_v41 }
 0x1ce   :  { %84 = vst.msk [vmem:[%s142_s2] sm:$0xff] %vm15_vm1, %v83_v43 }

</bundles_post_ra>
